<compile_context>
chip_gen: v6e
topology: v6e:2x2x1
jax: 0.10.0
libtpu: 0.0.40
codegen_flags: <defaults>
</compile_context>

<pallas_src>
import functools

import jax
import jax.numpy as jnp
from jax.experimental import pallas as pl
from jax.experimental.pallas import tpu as pltpu


def _round_up(x, m):
    return (x + m - 1) // m * m


# ----------------------------- kernel ---------------------------------------

def _disc_kernel(x_ref, w512_ref, w256_ref, bias_ref, out_ref):
    bf16 = jnp.bfloat16
    f32 = jnp.float32

    x = x_ref[...]                                                  # [TB, Kpad] bf16

    # trunk 1: x @ w1 + b1, ReLU                                    -> [TB, 512]
    h = jnp.dot(x, w512_ref[...], preferred_element_type=f32)
    h = jnp.maximum(h + bias_ref[0:1, :], 0.0)

    # trunk 2: h @ w2 + b2, ReLU                                    -> [TB, 256]
    h = jnp.dot(h.astype(bf16), w256_ref[0:512, :], preferred_element_type=f32)
    h = jnp.maximum(h + bias_ref[1:2, 0:256], 0.0)

    # fused heads layer 1: h @ [wl1 | wp1] + [bl1 | bp1], ReLU      -> [TB, 256]
    g = jnp.dot(h.astype(bf16), w256_ref[512:768, :], preferred_element_type=f32)
    g = jnp.maximum(g + bias_ref[2:3, 0:256], 0.0)

    # fused heads layer 2: blockdiag(wl2, wp2) + [bl2 | bp2], ReLU  -> [TB, 128]
    g = jnp.dot(g.astype(bf16), w256_ref[768:1024, 0:128],
                preferred_element_type=f32)
    g = jnp.maximum(g + bias_ref[3:4, 0:128], 0.0)

    # fused heads layer 3: logit -> lane 0, level -> lanes 1:3      -> [TB, 128]
    o = jnp.dot(g.astype(bf16), w256_ref[768:896, 128:256],
                preferred_element_type=f32)
    out_ref[...] = o + bias_ref[4:5, 0:128]


# --------------------------- parameters -------------------------------------

def init_params(key, input_dim):
    """Deterministic init mimicking nn.Linear's U(-1/sqrt(fan_in), 1/sqrt(fan_in))."""
    def linear(k, fan_in, fan_out):
        kw, kb = jax.random.split(k)
        bound = 1.0 / float(fan_in) ** 0.5
        w = jax.random.uniform(kw, (fan_in, fan_out), jnp.float32, -bound, bound)
        b = jax.random.uniform(kb, (1, fan_out), jnp.float32, -bound, bound)
        return w, b

    keys = jax.random.split(key, 8)
    p = {}
    p["w1"], p["b1"] = linear(keys[0], input_dim, 512)
    p["w2"], p["b2"] = linear(keys[1], 512, 256)
    p["wl1"], p["bl1"] = linear(keys[2], 256, 128)
    p["wl2"], p["bl2"] = linear(keys[3], 128, 64)
    p["wl3"], p["bl3"] = linear(keys[4], 64, 1)
    p["wp1"], p["bp1"] = linear(keys[5], 256, 128)
    p["wp2"], p["bp2"] = linear(keys[6], 128, 64)
    p["wp3"], p["bp3"] = linear(keys[7], 64, 2)
    return p


def pack_params(params):
    """One-time packing: fuse the two heads, coalesce into three slabs.

    Returns arrays only (all shape info is recoverable statically from the
    arrays inside jit):
      w512 : [Kpad, 512]  bf16   trunk layer 1 (input rows padded to Kpad)
      w256 : [1024, 256]  bf16   w2 | [wl1|wp1] | (blockdiag(wl2,wp2), wl3/wp3)
      bias : [8, 512]     f32    one row per layer
    """
    input_dim = params["w1"].shape[0]
    k_pad = _round_up(input_dim, 16)   # bf16 sublane-pack friendly, no 128 padding

    # Layer 1 weights, padded only to Kpad input rows (extra rows hit zero lanes).
    w512 = (jnp.zeros((k_pad, 512), jnp.float32)
            .at[:input_dim, :].set(params["w1"])
            .astype(jnp.bfloat16))

    # Fused head layer 1: [wl1 | wp1] -> [256, 256]
    wh1 = jnp.concatenate([params["wl1"], params["wp1"]], axis=1)

    # Fused head layer 2: block-diag(wl2, wp2) -> [256, 128]
    wh2 = jnp.zeros((256, 128), jnp.float32)
    wh2 = wh2.at[:128, :64].set(params["wl2"]).at[128:, 64:].set(params["wp2"])

    # Fused head layer 3: wl3 -> lane 0, wp3 -> lanes 1:3 -> [128, 128]
    # (kept at 128 lanes so the kernel output stays lane-dense)
    wh3 = jnp.zeros((128, 128), jnp.float32)
    wh3 = wh3.at[:64, 0:1].set(params["wl3"]).at[64:128, 1:3].set(params["wp3"])

    # Pack wh2 (cols 0:128) and wh3 (rows 0:128, cols 128:256) side by side.
    tail = jnp.zeros((256, 256), jnp.float32)
    tail = tail.at[:, :128].set(wh2).at[:128, 128:].set(wh3)

    w256 = jnp.concatenate([params["w2"], wh1, tail], axis=0).astype(jnp.bfloat16)

    # All biases in one f32 [8, 512] slab, one row per layer.
    bias = jnp.zeros((8, 512), jnp.float32)
    bias = bias.at[0, :512].set(params["b1"][0])
    bias = bias.at[1, :256].set(params["b2"][0])
    bias = bias.at[2, :128].set(params["bl1"][0]).at[2, 128:256].set(params["bp1"][0])
    bias = bias.at[3, :64].set(params["bl2"][0]).at[3, 64:128].set(params["bp2"][0])
    bias = bias.at[4, 0:1].set(params["bl3"][0]).at[4, 1:3].set(params["bp3"][0])

    return {"w512": w512, "w256": w256, "bias": bias}


# ----------------------------- forward --------------------------------------

def _run_disc(packed, feat_f32, tb):
    """feat_f32: [B, D] features -> (logit [B, 1], level [B, 2]).

    Batched grid over samples with weights held resident across all grid
    steps (constant index_map), batch axis marked "parallel" for megacore.
    """
    b, d = feat_f32.shape
    k_pad = packed["w512"].shape[0]
    if d > k_pad:
        raise ValueError(
            f"feature dim {d} exceeds packed input capacity {k_pad}; "
            f"re-run pack_params with the correct input_dim")

    b_pad = _round_up(max(b, 1), tb)
    x = jnp.zeros((b_pad, k_pad), jnp.bfloat16)
    x = x.at[:b, :d].set(feat_f32.astype(jnp.bfloat16))

    out = pl.pallas_call(
        _disc_kernel,
        out_shape=jax.ShapeDtypeStruct((b_pad, 128), jnp.float32),
        grid_spec=pltpu.PrefetchScalarGridSpec(
            num_scalar_prefetch=0,
            grid=(b_pad // tb,),
            in_specs=[
                # per-sample tile of features
                pl.BlockSpec((tb, k_pad), lambda i: (i, 0)),
                # weight/bias slabs: same block every step -> DMA'd once, resident
                pl.BlockSpec((k_pad, 512), lambda i: (0, 0)),
                pl.BlockSpec((1024, 256), lambda i: (0, 0)),
                pl.BlockSpec((8, 512), lambda i: (0, 0)),
            ],
            out_specs=pl.BlockSpec((tb, 128), lambda i: (i, 0)),
        ),
        compiler_params=pltpu.CompilerParams(
            dimension_semantics=("parallel",)),   # v7x: 2 TCs split the batch
    )(x, packed["w512"], packed["w256"], packed["bias"])

    # logit in lane 0, level in lanes 1:3
    return out[:b, 0:1], out[:b, 1:3]


@jax.jit
def discriminator_forward(packed, actions, stage):
    """Original module semantics: one sample, returns ((1,1), (1,2))."""
    feat = jnp.concatenate([actions.reshape(1, -1).astype(jnp.float32),
                            stage.reshape(1, -1).astype(jnp.float32)], axis=1)
    return _run_disc(packed, feat, tb=16)


@functools.partial(jax.jit, static_argnames=("tb",))
def discriminator_forward_batched(packed, actions, stage, tb=16):
    """Batched forward: actions [B, ...], stage [B, ...] -> ((B,1), (B,2)).

    Amortizes weight DMA and dispatch over the batch. In production use
    tb=128 (v5e) or tb=256 (v6e / v7x) to fill the MXU.
    """
    b = actions.shape[0]
    feat = jnp.concatenate([actions.reshape(b, -1).astype(jnp.float32),
                            stage.reshape(b, -1).astype(jnp.float32)], axis=1)
    return _run_disc(packed, feat, tb)


# --------------------------- references -------------------------------------

def _reference_feat_f32(params, feat):
    """Pure f32 reference on pre-built features [B, D]."""
    h = jnp.maximum(feat @ params["w1"] + params["b1"], 0.0)
    h = jnp.maximum(h @ params["w2"] + params["b2"], 0.0)
    l = jnp.maximum(h @ params["wl1"] + params["bl1"], 0.0)
    l = jnp.maximum(l @ params["wl2"] + params["bl2"], 0.0)
    logit = l @ params["wl3"] + params["bl3"]
    p = jnp.maximum(h @ params["wp1"] + params["bp1"], 0.0)
    p = jnp.maximum(p @ params["wp2"] + params["bp2"], 0.0)
    level = p @ params["wp3"] + params["bp3"]
    return logit, level


def _reference_feat_bf16(params, feat):
    """Reference mirroring the kernel's precision (bf16 operands, f32 accumulate)."""
    bf16 = jnp.bfloat16

    def layer(h, w, b, relu=True):
        y = jnp.dot(h.astype(bf16), w.astype(bf16),
                    preferred_element_type=jnp.float32) + b
        return jnp.maximum(y, 0.0) if relu else y

    h = layer(feat, params["w1"], params["b1"])
    h = layer(h, params["w2"], params["b2"])
    l = layer(h, params["wl1"], params["bl1"])
    l = layer(l, params["wl2"], params["bl2"])
    logit = layer(l, params["wl3"], params["bl3"], relu=False)
    p = layer(h, params["wp1"], params["bp1"])
    p = layer(p, params["wp2"], params["bp2"])
    level = layer(p, params["wp3"], params["bp3"], relu=False)
    return logit, level


def _features(actions, stage):
    b = actions.shape[0]
    return jnp.concatenate([actions.reshape(b, -1).astype(jnp.float32),
                            stage.reshape(b, -1).astype(jnp.float32)], axis=1)


# ------------------------------ main -----------------------------------------

if __name__ == "__main__":
    key = jax.random.PRNGKey(0)
    k_param, k_act, k_stage, k_act_b, k_stage_b = jax.random.split(key, 5)

    # actions: (3, 8) -> 24 features; stage: (8,) -> 8 features; input_dim = 32
    actions = jax.random.normal(k_act, (3, 8), jnp.float32)
    stage = jax.random.normal(k_stage, (8,), jnp.float32)
    input_dim = actions.size + stage.size

    params = init_params(k_param, input_dim)
    packed = jax.device_put(pack_params(params))   # one-time packing

    # ---- single-sample path (exact module semantics) ----
    logit_out, level_out = discriminator_forward(packed, actions, stage)
    jax.block_until_ready((logit_out, level_out))
    assert logit_out.shape == (1, 1) and level_out.shape == (1, 2)

    feat1 = _features(actions.reshape(1, 3, 8), stage.reshape(1, 8))
    ref_logit_bf, ref_level_bf = _reference_feat_bf16(params, feat1)
    assert jnp.allclose(logit_out, ref_logit_bf, atol=5e-3, rtol=5e-3)
    assert jnp.allclose(level_out, ref_level_bf, atol=5e-3, rtol=5e-3)
    ref_logit, ref_level = _reference_feat_f32(params, feat1)
    assert jnp.allclose(logit_out, ref_logit, atol=5e-2, rtol=5e-2)
    assert jnp.allclose(level_out, ref_level, atol=5e-2, rtol=5e-2)

    # ---- batched path (weights resident across the grid) ----
    B = 32
    actions_b = jax.random.normal(k_act_b, (B, 3, 8), jnp.float32)
    stage_b = jax.random.normal(k_stage_b, (B, 8), jnp.float32)

    logit_b, level_b = discriminator_forward_batched(packed, actions_b, stage_b, tb=16)
    jax.block_until_ready((logit_b, level_b))
    assert logit_b.shape == (B, 1) and level_b.shape == (B, 2)

    feat_b = _features(actions_b, stage_b)
    ref_logit_bf_b, ref_level_bf_b = _reference_feat_bf16(params, feat_b)
    assert jnp.allclose(logit_b, ref_logit_bf_b, atol=5e-3, rtol=5e-3)
    assert jnp.allclose(level_b, ref_level_bf_b, atol=5e-3, rtol=5e-3)
    ref_logit_b, ref_level_b = _reference_feat_f32(params, feat_b)
    assert jnp.allclose(logit_b, ref_logit_b, atol=5e-2, rtol=5e-2)
    assert jnp.allclose(level_b, ref_level_b, atol=5e-2, rtol=5e-2)

    print("KERNEL_OK")
</pallas_src>

<mosaic_0001>
module attributes {stable_mosaic.version = 11 : i64} {
  func.func @_disc_kernel(%arg0: i32, %arg1: memref<16x32xbf16, #tpu.memory_space<vmem>>, %arg2: memref<32x512xbf16, #tpu.memory_space<vmem>>, %arg3: memref<1024x256xbf16, #tpu.memory_space<vmem>>, %arg4: memref<8x512xf32, #tpu.memory_space<vmem>>, %arg5: memref<16x128xf32, #tpu.memory_space<vmem>>) attributes {dimension_semantics = [#tpu.dimension_semantics<parallel>], iteration_bounds = array<i64: 1>, scalar_prefetch = 0 : i64, scratch_operands = 0 : i64, tpu.core_type = #tpu.core_type<tc>, window_params = [{transform_indices = @transform_0, window_bounds = array<i64: 16, 32>}, {pipeline_mode = #tpu.pipeline_mode<synchronous>, transform_indices = @transform_1, window_bounds = array<i64: 32, 512>}, {pipeline_mode = #tpu.pipeline_mode<synchronous>, transform_indices = @transform_2, window_bounds = array<i64: 1024, 256>}, {pipeline_mode = #tpu.pipeline_mode<synchronous>, transform_indices = @transform_3, window_bounds = array<i64: 8, 512>}, {transform_indices = @transform_4, window_bounds = array<i64: 16, 128>}]} {
    %c0 = arith.constant 0 : index
    %c0_0 = arith.constant 0 : index
    %0 = vector.load %arg1[%c0, %c0_0] : memref<16x32xbf16, #tpu.memory_space<vmem>>, vector<16x32xbf16>
    %c0_1 = arith.constant 0 : index
    %c0_2 = arith.constant 0 : index
    %1 = vector.load %arg2[%c0_1, %c0_2] : memref<32x512xbf16, #tpu.memory_space<vmem>>, vector<32x512xbf16>
    %cst = arith.constant dense<0.000000e+00> : vector<16x512xf32>
    %2 = tpu.matmul %0, %1, %cst {dimension_numbers = #tpu.dot_dimension_numbers<[1], [0], [0], [1], [0, 0, 1, 1], [], []>} : vector<16x32xbf16>, vector<32x512xbf16>, vector<16x512xf32> -> vector<16x512xf32>
    %c0_3 = arith.constant 0 : index
    %c0_4 = arith.constant 0 : index
    %3 = vector.load %arg4[%c0_3, %c0_4] : memref<8x512xf32, #tpu.memory_space<vmem>>, vector<1x512xf32>
    %4 = vector.broadcast %3 : vector<1x512xf32> to vector<16x512xf32>
    %5 = arith.addf %2, %4 : vector<16x512xf32>
    %cst_5 = arith.constant 0.000000e+00 : f32
    %6 = vector.broadcast %cst_5 : f32 to vector<16x512xf32>
    %7 = arith.maximumf %5, %6 : vector<16x512xf32>
    %8 = arith.truncf %7 : vector<16x512xf32> to vector<16x512xbf16>
    %c0_6 = arith.constant 0 : index
    %c0_7 = arith.constant 0 : index
    %9 = vector.load %arg3[%c0_6, %c0_7] : memref<1024x256xbf16, #tpu.memory_space<vmem>>, vector<512x256xbf16>
    %cst_8 = arith.constant dense<0.000000e+00> : vector<16x256xf32>
    %10 = tpu.matmul %8, %9, %cst_8 {dimension_numbers = #tpu.dot_dimension_numbers<[1], [0], [0], [1], [0, 0, 1, 1], [], []>} : vector<16x512xbf16>, vector<512x256xbf16>, vector<16x256xf32> -> vector<16x256xf32>
    %c1 = arith.constant 1 : index
    %c0_9 = arith.constant 0 : index
    %11 = vector.load %arg4[%c1, %c0_9] : memref<8x512xf32, #tpu.memory_space<vmem>>, vector<1x256xf32>
    %12 = vector.broadcast %11 : vector<1x256xf32> to vector<16x256xf32>
    %13 = arith.addf %10, %12 : vector<16x256xf32>
    %cst_10 = arith.constant 0.000000e+00 : f32
    %14 = vector.broadcast %cst_10 : f32 to vector<16x256xf32>
    %15 = arith.maximumf %13, %14 : vector<16x256xf32>
    %16 = arith.truncf %15 : vector<16x256xf32> to vector<16x256xbf16>
    %c512 = arith.constant 512 : index
    %c0_11 = arith.constant 0 : index
    %17 = vector.load %arg3[%c512, %c0_11] : memref<1024x256xbf16, #tpu.memory_space<vmem>>, vector<256x256xbf16>
    %cst_12 = arith.constant dense<0.000000e+00> : vector<16x256xf32>
    %18 = tpu.matmul %16, %17, %cst_12 {dimension_numbers = #tpu.dot_dimension_numbers<[1], [0], [0], [1], [0, 0, 1, 1], [], []>} : vector<16x256xbf16>, vector<256x256xbf16>, vector<16x256xf32> -> vector<16x256xf32>
    %c2 = arith.constant 2 : index
    %c0_13 = arith.constant 0 : index
    %19 = vector.load %arg4[%c2, %c0_13] : memref<8x512xf32, #tpu.memory_space<vmem>>, vector<1x256xf32>
    %20 = vector.broadcast %19 : vector<1x256xf32> to vector<16x256xf32>
    %21 = arith.addf %18, %20 : vector<16x256xf32>
    %cst_14 = arith.constant 0.000000e+00 : f32
    %22 = vector.broadcast %cst_14 : f32 to vector<16x256xf32>
    %23 = arith.maximumf %21, %22 : vector<16x256xf32>
    %24 = arith.truncf %23 : vector<16x256xf32> to vector<16x256xbf16>
    %c768 = arith.constant 768 : index
    %c0_15 = arith.constant 0 : index
    %25 = vector.load %arg3[%c768, %c0_15] : memref<1024x256xbf16, #tpu.memory_space<vmem>>, vector<256x128xbf16>
    %cst_16 = arith.constant dense<0.000000e+00> : vector<16x128xf32>
    %26 = tpu.matmul %24, %25, %cst_16 {dimension_numbers = #tpu.dot_dimension_numbers<[1], [0], [0], [1], [0, 0, 1, 1], [], []>} : vector<16x256xbf16>, vector<256x128xbf16>, vector<16x128xf32> -> vector<16x128xf32>
    %c3 = arith.constant 3 : index
    %c0_17 = arith.constant 0 : index
    %27 = vector.load %arg4[%c3, %c0_17] : memref<8x512xf32, #tpu.memory_space<vmem>>, vector<1x128xf32>
    %28 = vector.broadcast %27 : vector<1x128xf32> to vector<16x128xf32>
    %29 = arith.addf %26, %28 : vector<16x128xf32>
    %cst_18 = arith.constant 0.000000e+00 : f32
    %30 = vector.broadcast %cst_18 : f32 to vector<16x128xf32>
    %31 = arith.maximumf %29, %30 : vector<16x128xf32>
    %32 = arith.truncf %31 : vector<16x128xf32> to vector<16x128xbf16>
    %c768_19 = arith.constant 768 : index
    %c128 = arith.constant 128 : index
    %33 = vector.load %arg3[%c768_19, %c128] : memref<1024x256xbf16, #tpu.memory_space<vmem>>, vector<128x128xbf16>
    %cst_20 = arith.constant dense<0.000000e+00> : vector<16x128xf32>
    %34 = tpu.matmul %32, %33, %cst_20 {dimension_numbers = #tpu.dot_dimension_numbers<[1], [0], [0], [1], [0, 0, 1, 1], [], []>} : vector<16x128xbf16>, vector<128x128xbf16>, vector<16x128xf32> -> vector<16x128xf32>
    %c4 = arith.constant 4 : index
    %c0_21 = arith.constant 0 : index
    %35 = vector.load %arg4[%c4, %c0_21] : memref<8x512xf32, #tpu.memory_space<vmem>>, vector<1x128xf32>
    %36 = vector.broadcast %35 : vector<1x128xf32> to vector<16x128xf32>
    %37 = arith.addf %34, %36 : vector<16x128xf32>
    %c0_22 = arith.constant 0 : index
    %c0_23 = arith.constant 0 : index
    %38 = vector.load %arg5[%c0_22, %c0_23] : memref<16x128xf32, #tpu.memory_space<vmem>>, vector<16x128xf32>
    tpu.vector_store %arg5[%c0_22, %c0_23], %37 {strides = array<i32>} : memref<16x128xf32, #tpu.memory_space<vmem>>, vector<16x128xf32>,
    return
  }
  func.func @transform_0(%arg0: i32) -> (i32, i32) {
    %c0_i32 = arith.constant 0 : i32
    %c0_i32_0 = arith.constant 0 : i32
    return %arg0, %c0_i32 : i32, i32
  }
  func.func @transform_1(%arg0: i32) -> (i32, i32) {
    %c0_i32 = arith.constant 0 : i32
    %c0_i32_0 = arith.constant 0 : i32
    %c0_i32_1 = arith.constant 0 : i32
    return %c0_i32, %c0_i32_0 : i32, i32
  }
  func.func @transform_2(%arg0: i32) -> (i32, i32) {
    %c0_i32 = arith.constant 0 : i32
    %c0_i32_0 = arith.constant 0 : i32
    %c0_i32_1 = arith.constant 0 : i32
    return %c0_i32, %c0_i32_0 : i32, i32
  }
  func.func @transform_3(%arg0: i32) -> (i32, i32) {
    %c0_i32 = arith.constant 0 : i32
    %c0_i32_0 = arith.constant 0 : i32
    %c0_i32_1 = arith.constant 0 : i32
    return %c0_i32, %c0_i32_0 : i32, i32
  }
  func.func @transform_4(%arg0: i32) -> (i32, i32) {
    %c0_i32 = arith.constant 0 : i32
    %c0_i32_0 = arith.constant 0 : i32
    return %arg0, %c0_i32 : i32, i32
  }
}

</mosaic_0001>

<bundles_post_ra>
// kernel: discriminator_forward.1
= control target key start
LH: loop header
LB: loop body
LE: loop exit
PB: predicated region body
PF: predicated region fallthrough
CT: control target
= control target key end

     0   :  { %9 = vsyncpa [#allocation3], 0  ;;  %s1766_s0 = inlined_call_operand.vmem [shape: bf16[16,32], index: 0, kind: input, shape index: {}]   ;;  %s1767_s1 = inlined_call_operand.hbm [shape: bf16[32,512], index: 1, kind: input, shape index: {}]   ;;  %s1768_s2 = inlined_call_operand.hbm [shape: bf16[1024,256], index: 2, kind: input, shape index: {}]   ;;  %s1769_s3 = inlined_call_operand.hbm [shape: f32[8,512], index: 3, kind: input, shape index: {}]   ;;  %s1770_s4 = inlined_call_operand.vmem [shape: f32[16,128], index: 4, kind: output, shape index: {}]  }
   0x1   :  { %10 = vsyncpa [#allocation5], 0  ;;  %s1703_s15 = smov [#allocation4]  }
   0x2   :  { %s30_s16 = sshll.u32 %s1703_s15, 4  ;;  %s31_s16 = int_to_ptr.vmem [resolvable:$true] %s30_s16 }
   0x3   :  { %s1647_s17 = scalar_lea.vmem %s31_s16, 16384  ;;  %p1652_p1 = scmp.lt.s32.totalorder %s31_s16, %s31_s16 }
   0x4   :  { %p1648_p0 = scmp.ne.s32.totalorder %s31_s16, %s1647_s17  ;;  %p1653_p2 = scmp.lt.s32.totalorder %s1647_s17, %s1647_s17 }
   0x6   :  { %p1654_p3 = por %p1653_p2, %p1652_p1 }
   0x8   :  { %p1655_p4 = pnand %p1654_p3, %p1648_p0 }
   0xa   :  { %1658 = shalt.err (!%p1655_p4)
}
   0xb   :  { %s1704_s18 = smov 128   ;;  %s1705_s19 = smov 8  }
   0xc   :  { %36 = dma.hbm_to_vmem [thread:$0]  %s1768_s2, 16384, %s31_s16, [#allocation5], %s1704_s18, %s1704_s18, %s1705_s19  }
   0xd   :  { %s1706_s22 = smov [#allocation2]  }
   0xe   :  { %s18_s23 = sshll.u32 %s1706_s22, 4  ;;  %s19_s23 = int_to_ptr.vmem [resolvable:$true] %s18_s23 }
   0xf   :  { %s1667_s24 = scalar_lea.vmem %s19_s23, 1024  ;;  %p1672_p6 = scmp.lt.s32.totalorder %s19_s23, %s19_s23 }
  0x10   :  { %p1668_p5 = scmp.ne.s32.totalorder %s19_s23, %s1667_s24  ;;  %p1673_p7 = scmp.lt.s32.totalorder %s1667_s24, %s1667_s24 }
  0x12   :  { %p1674_p8 = por %p1673_p7, %p1672_p6 }
  0x14   :  { %p1675_p9 = pnand %p1674_p8, %p1668_p5 }
  0x16   :  { %1678 = shalt.err (!%p1675_p9)
}
  0x17   :  { %s1707_s25 = smov 256   ;;  %s1708_s26 = smov 16  }
  0x18   :  { %24 = dma.hbm_to_vmem [thread:$0]  %s1767_s1, 1024, %s19_s23, [#allocation3], %s1707_s25, %s1707_s25, %s1708_s26  }
  0x19   :  { %s1709_s29 = smov [#allocation6]  }
  0x1a   :  { %s43_s30 = sshll.u32 %s1709_s29, 4  ;;  %s44_s30 = int_to_ptr.vmem [resolvable:$true] %s43_s30 }
  0x1b   :  { %s1687_s2 = scalar_lea.vmem %s44_s30, 512  ;;  %p1692_p11 = scmp.lt.s32.totalorder %s44_s30, %s44_s30 }
  0x1c   :  { %p1688_p10 = scmp.ne.s32.totalorder %s44_s30, %s1687_s2  ;;  %p1693_p12 = scmp.lt.s32.totalorder %s1687_s2, %s1687_s2 }
  0x1e   :  { %p1694_p13 = por %p1693_p12, %p1692_p11 }
  0x20   :  { %p1695_p0 = pnand %p1694_p13, %p1688_p10 }
  0x22   :  { %1698 = shalt.err (!%p1695_p0)
}
  0x23   :  { %46 = dma.hbm_to_vmem [thread:$0]  %s1769_s3, 512, %s44_s30, [#allocation5]  }
  0x24   :  { %1699 = dma.done.wait [#allocation3], 1024  }
  0x25   :  { %1700 = vsyncadd [#allocation3], 4294966272 }
  0x26   :  { %1701 = dma.done.wait [#allocation5], 16896  }
  0x27   :  { %1702 = vsyncadd [#allocation5], 4294950400  ;;  %v1710_v0 = vmov 0   ;;  %v1458_v1 = vld [vmem:[#allocation2 + $0x24] ss:$16 sps:$4 sm:$0xff]   ;;  %vm134_vm0 = vcmask 261120  }
  0x28   :  { %170 = vmatprep.mubr.bf16.mxu0 %v1710_v0  ;;  %213 = vmatprep.mubr.bf16.mxu1 %v1710_v0  ;;  %v1460_v2 = vld [vmem:[#allocation2 + $0x2c] ss:$16 sps:$4 sm:$0xff]   ;;  %v1462_v3 = vld [vmem:[#allocation2 + $0x20] ss:$16 sps:$4 sm:$0xff]   ;;  %v1463_v4 = vld [vmem:[#allocation2 + $0x28] ss:$16 sps:$4 sm:$0xff]  }
  0x29   :  { %150 = vmatprep.subr.bf16.mxu0 %v1458_v1  ;;  %193 = vmatprep.subr.bf16.mxu1 %v1460_v2  ;;  %v1464_v5 = vld [vmem:[#allocation2 + $0x4] ss:$16 sps:$4 sm:$0xff]   ;;  %v1466_v6 = vld [vmem:[#allocation2 + $0xc] ss:$16 sps:$4 sm:$0xff]   ;;  %v1468_v7 = vld [vmem:[#allocation2] ss:$16 sps:$4 sm:$0xff]  }
  0x2a   :  { %151 = vmatpush1.bf16.msra.mxu0 %v1462_v3  ;;  %194 = vmatpush1.bf16.msra.mxu1 %v1463_v4  ;;  %v1469_v8 = vld [vmem:[#allocation2 + $0x8] ss:$16 sps:$4 sm:$0xff]   ;;  %v1470_v9 = vld [vmem:[%s1766_s0] sm:$0xff]   ;;  %v1473_v11 = vld [vmem:[#allocation4 + $0x74] ss:$8 sps:$4 sm:$0xff]   ;;  %vm1712_vm1 = vmmov 0  }
  0x2b   :  { %152 = vmatprep.subr.bf16.mxu0 %v1464_v5  ;;  %195 = vmatprep.subr.bf16.mxu1 %v1466_v6  ;;  %v1471_v10 = vld [vmem:[#allocation4 + $0x70] ss:$8 sps:$4 sm:$0xff]   ;;  %v1476_v13 = vld [vmem:[#allocation4 + $0x174] ss:$8 sps:$4 sm:$0xff]   ;;  %v1479_v14 = vld [vmem:[#allocation4 + $0x64] ss:$8 sps:$4 sm:$0xff]  }
  0x2c   :  { %v1474_v12 = vld [vmem:[#allocation4 + $0x170] ss:$8 sps:$4 sm:$0xff]   ;;  %v1482_v15 = vld [vmem:[#allocation4 + $0x164] ss:$8 sps:$4 sm:$0xff]   ;;  %v1477_v16 = vld [vmem:[#allocation4 + $0x60] ss:$8 sps:$4 sm:$0xff]  }
  0x2d   :  { %v1480_v17 = vld [vmem:[#allocation4 + $0x160] ss:$8 sps:$4 sm:$0xff]   ;;  %v1485_v18 = vld [vmem:[#allocation4 + $0x54] ss:$8 sps:$4 sm:$0xff]   ;;  %v1483_v20 = vld [vmem:[#allocation4 + $0x50] ss:$8 sps:$4 sm:$0xff]  }
  0x2e   :  { %153 = vmatpush1.bf16.msra.mxu0 %v1468_v7  ;;  %196 = vmatpush1.bf16.msra.mxu1 %v1469_v8  ;;  %v1488_v19 = vld [vmem:[#allocation4 + $0x154] ss:$8 sps:$4 sm:$0xff]   ;;  %v1486_v21 = vld [vmem:[#allocation4 + $0x150] ss:$8 sps:$4 sm:$0xff]   ;;  %v1491_v22 = vld [vmem:[#allocation4 + $0x44] ss:$8 sps:$4 sm:$0xff]  }
  0x2f   :  { %633 = vmatprep.subr.bf16.mxu0 %v1473_v11  ;;  %676 = vmatprep.subr.bf16.mxu1 %v1476_v13  ;;  %v1494_v23 = vld [vmem:[#allocation4 + $0x144] ss:$8 sps:$4 sm:$0xff]   ;;  %v1489_v24 = vld [vmem:[#allocation4 + $0x40] ss:$8 sps:$4 sm:$0xff]   ;;  %v1497_v26 = vld [vmem:[#allocation4 + $0x34] ss:$8 sps:$4 sm:$0xff]   ;;  %v69_v11 = vlaneseq }
  0x30   :  { %v1492_v25 = vld [vmem:[#allocation4 + $0x140] ss:$8 sps:$4 sm:$0xff]   ;;  %v1500_v27 = vld [vmem:[#allocation4 + $0x134] ss:$8 sps:$4 sm:$0xff]   ;;  %v1495_v28 = vld [vmem:[#allocation4 + $0x30] ss:$8 sps:$4 sm:$0xff]  }
  0x31   :  { %1275 = vmatmul.mubr.msk.bf16.vlgmr.msra.gmra.mxu0 %vm134_vm0, %v1470_v9  ;;  %1276 = vmatmul.mubr.msk.bf16.vlgmr.msra.gmra.mxu1 %vm134_vm0, %v1470_v9  ;;  %v1498_v29 = vld [vmem:[#allocation4 + $0x130] ss:$8 sps:$4 sm:$0xff]   ;;  %v1503_v30 = vld [vmem:[#allocation4 + $0x24] ss:$8 sps:$4 sm:$0xff]   ;;  %v1501_v32 = vld [vmem:[#allocation4 + $0x20] ss:$8 sps:$4 sm:$0xff]  }
  0x32   :  { %634 = vmatpush1.bf16.msra.mxu0 %v1471_v10  ;;  %677 = vmatpush1.bf16.msra.mxu1 %v1474_v12  ;;  %v1506_v31 = vld [vmem:[#allocation4 + $0x124] ss:$8 sps:$4 sm:$0xff]   ;;  %v1504_v33 = vld [vmem:[#allocation4 + $0x120] ss:$8 sps:$4 sm:$0xff]   ;;  %v1509_v34 = vld [vmem:[#allocation4 + $0x14] ss:$8 sps:$4 sm:$0xff]  }
  0x33   :  { %635 = vmatprep.subr.bf16.mxu0 %v1479_v14  ;;  %678 = vmatprep.subr.bf16.mxu1 %v1482_v15  ;;  %v1512_v35 = vld [vmem:[#allocation4 + $0x114] ss:$8 sps:$4 sm:$0xff]   ;;  %v1507_v36 = vld [vmem:[#allocation4 + $0x10] ss:$8 sps:$4 sm:$0xff]   ;;  %v1515_v38 = vld [vmem:[#allocation4 + $0x4] ss:$8 sps:$4 sm:$0xff]  }
  0x34   :  { %v1510_v37 = vld [vmem:[#allocation4 + $0x110] ss:$8 sps:$4 sm:$0xff]   ;;  %v1518_v39 = vld [vmem:[#allocation4 + $0x104] ss:$8 sps:$4 sm:$0xff]   ;;  %v1513_v40 = vld [vmem:[#allocation4] ss:$8 sps:$4 sm:$0xff]  }
  0x35   :  { %v1516_v41 = vld [vmem:[#allocation4 + $0x100] ss:$8 sps:$4 sm:$0xff]   ;;  %v1521_v42 = vld [vmem:[#allocation4 + $0xf4] ss:$8 sps:$4 sm:$0xff]   ;;  %v1519_v44 = vld [vmem:[#allocation4 + $0xf0] ss:$8 sps:$4 sm:$0xff]  }
  0x36   :  { %636 = vmatpush1.bf16.msra.mxu0 %v1477_v16  ;;  %679 = vmatpush1.bf16.msra.mxu1 %v1480_v17  ;;  %v1524_v43 = vld [vmem:[#allocation4 + $0x1f4] ss:$8 sps:$4 sm:$0xff]   ;;  %v1522_v45 = vld [vmem:[#allocation4 + $0x1f0] ss:$8 sps:$4 sm:$0xff]   ;;  %v1527_v46 = vld [vmem:[#allocation4 + $0xe4] ss:$8 sps:$4 sm:$0xff]  }
  0x37   :  { %637 = vmatprep.subr.bf16.mxu0 %v1485_v18  ;;  %680 = vmatprep.subr.bf16.mxu1 %v1488_v19  ;;  %v1530_v47 = vld [vmem:[#allocation4 + $0x1e4] ss:$8 sps:$4 sm:$0xff]   ;;  %v1525_v48 = vld [vmem:[#allocation4 + $0xe0] ss:$8 sps:$4 sm:$0xff]   ;;  %v1533_v50 = vld [vmem:[#allocation4 + $0xd4] ss:$8 sps:$4 sm:$0xff]  }
  0x38   :  { %v1528_v49 = vld [vmem:[#allocation4 + $0x1e0] ss:$8 sps:$4 sm:$0xff]   ;;  %v1536_v51 = vld [vmem:[#allocation4 + $0x1d4] ss:$8 sps:$4 sm:$0xff]   ;;  %v1531_v52 = vld [vmem:[#allocation4 + $0xd0] ss:$8 sps:$4 sm:$0xff]  }
  0x39   :  { %v1534_v53 = vld [vmem:[#allocation4 + $0x1d0] ss:$8 sps:$4 sm:$0xff]   ;;  %v1539_v54 = vld [vmem:[#allocation4 + $0xc4] ss:$8 sps:$4 sm:$0xff]   ;;  %v1537_v56 = vld [vmem:[#allocation4 + $0xc0] ss:$8 sps:$4 sm:$0xff]  }
  0x3a   :  { %638 = vmatpush1.bf16.msra.mxu0 %v1483_v20  ;;  %681 = vmatpush1.bf16.msra.mxu1 %v1486_v21  ;;  %v1542_v55 = vld [vmem:[#allocation4 + $0x1c4] ss:$8 sps:$4 sm:$0xff]   ;;  %v1540_v57 = vld [vmem:[#allocation4 + $0x1c0] ss:$8 sps:$4 sm:$0xff]   ;;  %v1545_v58 = vld [vmem:[#allocation4 + $0xb4] ss:$8 sps:$4 sm:$0xff]  }
  0x3b   :  { %639 = vmatprep.subr.bf16.mxu0 %v1491_v22  ;;  %682 = vmatprep.subr.bf16.mxu1 %v1494_v23  ;;  %v1548_v59 = vld [vmem:[#allocation4 + $0x1b4] ss:$8 sps:$4 sm:$0xff]   ;;  %v1543_v60 = vld [vmem:[#allocation4 + $0xb0] ss:$8 sps:$4 sm:$0xff]   ;;  %v1551_v62 = vld [vmem:[#allocation4 + $0xa4] ss:$8 sps:$4 sm:$0xff]  }
  0x3c   :  { %v1546_v61 = vld [vmem:[#allocation4 + $0x1b0] ss:$8 sps:$4 sm:$0xff]   ;;  %v1554_v63 = vld [vmem:[#allocation4 + $0x1a4] ss:$8 sps:$4 sm:$0xff]   ;;  %v1549_v0 = vld [vmem:[#allocation4 + $0xa0] ss:$8 sps:$4 sm:$0xff]  }
  0x3d   :  { %v1552_v1 = vld [vmem:[#allocation4 + $0x1a0] ss:$8 sps:$4 sm:$0xff]   ;;  %v1557_v2 = vld [vmem:[#allocation4 + $0x94] ss:$8 sps:$4 sm:$0xff]   ;;  %v1555_v4 = vld [vmem:[#allocation4 + $0x90] ss:$8 sps:$4 sm:$0xff]  }
  0x3e   :  { %640 = vmatpush1.bf16.msra.mxu0 %v1489_v24  ;;  %683 = vmatpush1.bf16.msra.mxu1 %v1492_v25  ;;  %v1560_v3 = vld [vmem:[#allocation4 + $0x194] ss:$8 sps:$4 sm:$0xff]   ;;  %v1558_v5 = vld [vmem:[#allocation4 + $0x190] ss:$8 sps:$4 sm:$0xff]   ;;  %v1563_v6 = vld [vmem:[#allocation4 + $0x84] ss:$8 sps:$4 sm:$0xff]  }
  0x3f   :  { %641 = vmatprep.subr.bf16.mxu0 %v1497_v26  ;;  %684 = vmatprep.subr.bf16.mxu1 %v1500_v27  ;;  %v1566_v7 = vld [vmem:[#allocation4 + $0x184] ss:$8 sps:$4 sm:$0xff]   ;;  %v1561_v8 = vld [vmem:[#allocation4 + $0x80] ss:$8 sps:$4 sm:$0xff]   ;;  %v1569_v10 = vld [vmem:[#allocation4 + $0x274] ss:$8 sps:$4 sm:$0xff]  }
  0x40   :  { %v1564_v9 = vld [vmem:[#allocation4 + $0x180] ss:$8 sps:$4 sm:$0xff]   ;;  %v70_v12 = vshrl.u32 %v69_v11, 7  ;;  %v1608_v11 = vld [vmem:[#allocation4 + $0x2a4] ss:$8 sps:$4 sm:$0xff]  }
  0x41   :  { %v67_v17 = vld [vmem:[#allocation6] ss:$8 sm:$0xf] }
  0x42   :  { %642 = vmatpush1.bf16.msra.mxu0 %v1495_v28  ;;  %685 = vmatpush1.bf16.msra.mxu1 %v1498_v29  ;;  %v1750_v13 = vsub.s32 1, %v70_v12  ;;  %v83_v14 = vsub.s32 3, %v70_v12  ;;  %v1752_v15 = vsub.s32 0, %v70_v12  ;;  %v79_v16 = vsub.s32 2, %v70_v12  ;;  %v1606_v12 = vld [vmem:[#allocation4 + $0x2a0] ss:$8 sps:$4 sm:$0xff]  }
  0x43   :  { %643 = vmatprep.subr.bf16.mxu0 %v1503_v30  ;;  %686 = vmatprep.subr.bf16.mxu1 %v1506_v31 }
  0x44   :  { %v76_v20 = vrot.slane %v67_v17, %v1750_v13  ;;  %v84_v21 = vrot.slane %v67_v17, %v83_v14  ;;  %v72_v22 = vrot.slane %v67_v17, %v1752_v15  ;;  %v80_v23 = vrot.slane %v67_v17, %v79_v16  ;;  %v1611_v14 = vld [vmem:[#allocation4 + $0x294] ss:$8 sps:$4 sm:$0xff]   ;;  %v1609_v16 = vld [vmem:[#allocation4 + $0x290] ss:$8 sps:$4 sm:$0xff]   ;;  %v1614_v17 = vld [vmem:[#allocation4 + $0x284] ss:$8 sps:$4 sm:$0xff]  }
  0x46   :  { %644 = vmatpush1.bf16.msra.mxu0 %v1501_v32  ;;  %687 = vmatpush1.bf16.msra.mxu1 %v1504_v33 }
  0x47   :  { %645 = vmatprep.subr.bf16.mxu0 %v1509_v34  ;;  %688 = vmatprep.subr.bf16.mxu1 %v1512_v35 }
  0x4a   :  { %646 = vmatpush1.bf16.msra.mxu0 %v1507_v36  ;;  %689 = vmatpush1.bf16.msra.mxu1 %v1510_v37 }
  0x4b   :  { %647 = vmatprep.subr.bf16.mxu0 %v1515_v38  ;;  %690 = vmatprep.subr.bf16.mxu1 %v1518_v39 }
  0x4e   :  { %648 = vmatpush1.bf16.msra.mxu0 %v1513_v40  ;;  %691 = vmatpush1.bf16.msra.mxu1 %v1516_v41 }
  0x4f   :  { %649 = vmatprep.subr.bf16.mxu0 %v1521_v42  ;;  %692 = vmatprep.subr.bf16.mxu1 %v1524_v43 }
  0x52   :  { %650 = vmatpush2.bf16.msra.mxu0 %v1519_v44  ;;  %693 = vmatpush2.bf16.msra.mxu1 %v1522_v45 }
  0x53   :  { %651 = vmatprep.subr.bf16.mxu0 %v1527_v46  ;;  %694 = vmatprep.subr.bf16.mxu1 %v1530_v47 }
  0x56   :  { %652 = vmatpush2.bf16.msra.mxu0 %v1525_v48  ;;  %695 = vmatpush2.bf16.msra.mxu1 %v1528_v49  ;;  %v1567_v48 = vld [vmem:[#allocation4 + $0x270] ss:$8 sps:$4 sm:$0xff]  }
  0x57   :  { %653 = vmatprep.subr.bf16.mxu0 %v1533_v50  ;;  %696 = vmatprep.subr.bf16.mxu1 %v1536_v51  ;;  %v1572_v51 = vld [vmem:[#allocation4 + $0x264] ss:$8 sps:$4 sm:$0xff]  }
  0x5a   :  { %654 = vmatpush2.bf16.msra.mxu0 %v1531_v52  ;;  %697 = vmatpush2.bf16.msra.mxu1 %v1534_v53  ;;  %v1570_v52 = vld [vmem:[#allocation4 + $0x260] ss:$8 sps:$4 sm:$0xff]   ;;  %v1575_v53 = vld [vmem:[#allocation4 + $0x254] ss:$8 sps:$4 sm:$0xff]  }
  0x5b   :  { %655 = vmatprep.subr.bf16.mxu0 %v1539_v54  ;;  %698 = vmatprep.subr.bf16.mxu1 %v1542_v55  ;;  %v1573_v54 = vld [vmem:[#allocation4 + $0x250] ss:$8 sps:$4 sm:$0xff]   ;;  %v1578_v55 = vld [vmem:[#allocation4 + $0x244] ss:$8 sps:$4 sm:$0xff]  }
  0x5e   :  { %656 = vmatpush2.bf16.msra.mxu0 %v1537_v56  ;;  %699 = vmatpush2.bf16.msra.mxu1 %v1540_v57  ;;  %v1576_v56 = vld [vmem:[#allocation4 + $0x240] ss:$8 sps:$4 sm:$0xff]   ;;  %v1581_v57 = vld [vmem:[#allocation4 + $0x234] ss:$8 sps:$4 sm:$0xff]  }
  0x5f   :  { %657 = vmatprep.subr.bf16.mxu0 %v1545_v58  ;;  %700 = vmatprep.subr.bf16.mxu1 %v1548_v59  ;;  %v1579_v58 = vld [vmem:[#allocation4 + $0x230] ss:$8 sps:$4 sm:$0xff]   ;;  %v1584_v59 = vld [vmem:[#allocation4 + $0x224] ss:$8 sps:$4 sm:$0xff]  }
  0x62   :  { %658 = vmatpush2.bf16.msra.mxu0 %v1543_v60  ;;  %701 = vmatpush2.bf16.msra.mxu1 %v1546_v61  ;;  %v1582_v60 = vld [vmem:[#allocation4 + $0x220] ss:$8 sps:$4 sm:$0xff]   ;;  %v1587_v61 = vld [vmem:[#allocation4 + $0x214] ss:$8 sps:$4 sm:$0xff]  }
  0x63   :  { %659 = vmatprep.subr.bf16.mxu0 %v1551_v62  ;;  %702 = vmatprep.subr.bf16.mxu1 %v1554_v63  ;;  %v1585_v62 = vld [vmem:[#allocation4 + $0x210] ss:$8 sps:$4 sm:$0xff]   ;;  %v1590_v63 = vld [vmem:[#allocation4 + $0x204] ss:$8 sps:$4 sm:$0xff]  }
  0x66   :  { %660 = vmatpush2.bf16.msra.mxu0 %v1549_v0  ;;  %703 = vmatpush2.bf16.msra.mxu1 %v1552_v1  ;;  %v1588_v0 = vld [vmem:[#allocation4 + $0x200] ss:$8 sps:$4 sm:$0xff]   ;;  %v1593_v1 = vld [vmem:[#allocation4 + $0x2f4] ss:$8 sps:$4 sm:$0xff]  }
  0x67   :  { %661 = vmatprep.subr.bf16.mxu0 %v1557_v2  ;;  %704 = vmatprep.subr.bf16.mxu1 %v1560_v3  ;;  %v1591_v2 = vld [vmem:[#allocation4 + $0x2f0] ss:$8 sps:$4 sm:$0xff]   ;;  %v1596_v3 = vld [vmem:[#allocation4 + $0x2e4] ss:$8 sps:$4 sm:$0xff]  }
  0x6a   :  { %662 = vmatpush2.bf16.msra.mxu0 %v1555_v4  ;;  %705 = vmatpush2.bf16.msra.mxu1 %v1558_v5  ;;  %v1594_v4 = vld [vmem:[#allocation4 + $0x2e0] ss:$8 sps:$4 sm:$0xff]   ;;  %v1599_v5 = vld [vmem:[#allocation4 + $0x2d4] ss:$8 sps:$4 sm:$0xff]  }
  0x6b   :  { %663 = vmatprep.subr.bf16.mxu0 %v1563_v6  ;;  %706 = vmatprep.subr.bf16.mxu1 %v1566_v7  ;;  %v1597_v6 = vld [vmem:[#allocation4 + $0x2d0] ss:$8 sps:$4 sm:$0xff]   ;;  %v1602_v7 = vld [vmem:[#allocation4 + $0x2c4] ss:$8 sps:$4 sm:$0xff]  }
  0x6e   :  { %664 = vmatpush2.bf16.msra.mxu0 %v1561_v8  ;;  %707 = vmatpush2.bf16.msra.mxu1 %v1564_v9  ;;  %v1600_v8 = vld [vmem:[#allocation4 + $0x2c0] ss:$8 sps:$4 sm:$0xff]   ;;  %v1605_v9 = vld [vmem:[#allocation4 + $0x2b4] ss:$8 sps:$4 sm:$0xff]  }
  0x6f   :  { %930 = vmatprep.subr.bf16.mxu0 %v1569_v10  ;;  %v1603_v10 = vld [vmem:[#allocation4 + $0x2b0] ss:$8 sps:$4 sm:$0xff]  }
  0xf1   :  { %v172_v18 = vpop.f32.mrf.mxu0  ;;  %v215_v19 = vpop.f32.mrf.mxu1 }
  0xf2   :  { %v173_v32 = vadd.f32 %v172_v18, %v72_v22  ;;  %v216_v33 = vadd.f32 %v215_v19, %v80_v23  ;;  %v1612_v18 = vld [vmem:[#allocation4 + $0x280] ss:$8 sps:$4 sm:$0xff]   ;;  %v1615_v19 = vld [vmem:[#allocation4 + $0x3f0] ss:$8 sps:$4 sm:$0xff]  }
  0xf3   :  { %v174_v24 = vpop.f32.mrf.mxu0  ;;  %v217_v25 = vpop.f32.mrf.mxu1  ;;  %1397 = vmatprep.subr.bf16.mxu1 %v1615_v19  ;;  %v1636_v19 = vld [vmem:[#allocation4 + $0x324] ss:$8 sps:$4 sm:$0xff]  }
  0xf4   :  { %v175_v28 = vadd.f32 %v174_v24, %v76_v20  ;;  %v218_v29 = vadd.f32 %v217_v25, %v84_v21  ;;  %v224_v44 = vmax.f32 %v173_v32, 0.0  ;;  %v226_v45 = vmax.f32 %v216_v33, 0.0  ;;  %v1620_v24 = vld [vmem:[#allocation4 + $0x350] ss:$8 sps:$4 sm:$0xff]   ;;  %v1621_v25 = vld [vmem:[#allocation4 + $0x3c0] ss:$8 sps:$4 sm:$0xff]  }
  0xf5   :  { %v176_v26 = vpop.f32.mrf.mxu0  ;;  %v219_v27 = vpop.f32.mrf.mxu1 }
  0xf6   :  { %v177_v30 = vadd.f32 %v176_v26, %v72_v22  ;;  %v220_v31 = vadd.f32 %v219_v27, %v80_v23  ;;  %v225_v40 = vmax.f32 %v175_v28, 0.0  ;;  %v227_v41 = vmax.f32 %v218_v29, 0.0  ;;  %v1618_v22 = vld [vmem:[#allocation4 + $0x360] ss:$8 sps:$4 sm:$0xff]   ;;  %v1619_v23 = vld [vmem:[#allocation4 + $0x3d0] ss:$8 sps:$4 sm:$0xff]  }
  0xf7   :  { %v178_v34 = vpop.f32.mrf.mxu0  ;;  %v221_v35 = vpop.f32.mrf.mxu1  ;;  %v1622_v26 = vld [vmem:[#allocation4 + $0x340] ss:$8 sps:$4 sm:$0xff]   ;;  %v1623_v27 = vld [vmem:[#allocation4 + $0x3b0] ss:$8 sps:$4 sm:$0xff]  }
  0xf8   :  { %v179_v36 = vadd.f32 %v178_v34, %v76_v20  ;;  %v222_v37 = vadd.f32 %v221_v35, %v84_v21  ;;  %v228_v38 = vmax.f32 %v177_v30, 0.0  ;;  %v230_v39 = vmax.f32 %v220_v31, 0.0  ;;  %v1616_v20 = vld [vmem:[#allocation4 + $0x370] ss:$8 sps:$4 sm:$0xff]   ;;  %v1617_v21 = vld [vmem:[#allocation4 + $0x3e0] ss:$8 sps:$4 sm:$0xff]  }
  0xf9   :  { %v1624_v28 = vld [vmem:[#allocation4 + $0x330] ss:$8 sps:$4 sm:$0xff]   ;;  %v301_v29 = vld [vmem:[#allocation6 + $0x1] ss:$8 sm:$0x3] }
  0xfa   :  { %v229_v42 = vmax.f32 %v179_v36, 0.0  ;;  %v231_v43 = vmax.f32 %v222_v37, 0.0  ;;  %v232_v49 = vpack.c.bf16 %v228_v38, %v224_v44  ;;  %v234_v50 = vpack.c.bf16 %v230_v39, %v226_v45 }
  0xfb   :  { %v310_v30 = vrot.slane %v301_v29, %v1750_v13  ;;  %v306_v31 = vrot.slane %v301_v29, %v1752_v15 }
  0xfc   :  { %v233_v46 = vpack.c.bf16 %v229_v42, %v225_v40  ;;  %v235_v47 = vpack.c.bf16 %v231_v43, %v227_v41 }
  0xfe   :  { %665 = vmatprep.mubr.bf16.mxu0 %v233_v46  ;;  %708 = vmatprep.mubr.bf16.mxu1 %v235_v47 }
  0xff   :  { %666 = vmatmul.mubr.bf16.vlgmr.msra.gmra.mxu0 %v232_v49  ;;  %709 = vmatmul.mubr.bf16.vlgmr.msra.gmra.mxu1 %v234_v50 }
 0x100   :  { %931 = vmatpush1.bf16.msra.mxu0 %v1567_v48  ;;  %1398 = vmatpush3.bf16.msra.mxu1 %v1616_v20  ;;  %v1637_v20 = vld [vmem:[#allocation4 + $0x314] ss:$8 sps:$4 sm:$0xff]  }
 0x101   :  { %932 = vmatprep.subr.bf16.mxu0 %v1572_v51  ;;  %1399 = vmatprep.subr.bf16.mxu1 %v1617_v21  ;;  %v1638_v21 = vld [vmem:[#allocation4 + $0x304] ss:$8 sps:$4 sm:$0xff]  }
 0x104   :  { %933 = vmatpush1.bf16.msra.mxu0 %v1570_v52  ;;  %1400 = vmatpush3.bf16.msra.mxu1 %v1618_v22 }
 0x105   :  { %934 = vmatprep.subr.bf16.mxu0 %v1575_v53  ;;  %1401 = vmatprep.subr.bf16.mxu1 %v1619_v23 }
 0x108   :  { %935 = vmatpush1.bf16.msra.mxu0 %v1573_v54  ;;  %1402 = vmatpush3.bf16.msra.mxu1 %v1620_v24  ;;  %v1625_v54 = vld [vmem:[#allocation4 + $0x3a0] ss:$8 sps:$4 sm:$0xff]  }
 0x109   :  { %936 = vmatprep.subr.bf16.mxu0 %v1578_v55  ;;  %1403 = vmatprep.subr.bf16.mxu1 %v1621_v25  ;;  %v1626_v55 = vld [vmem:[#allocation4 + $0x320] ss:$8 sps:$4 sm:$0xff]  }
 0x10a   :  { %v1011_v25 = vld [vmem:[#allocation6 + $0x3] ss:$0 sm:$0xff] }
 0x10c   :  { %937 = vmatpush1.bf16.msra.mxu0 %v1576_v56  ;;  %1404 = vmatpush3.bf16.msra.mxu1 %v1622_v26  ;;  %v1627_v56 = vld [vmem:[#allocation4 + $0x390] ss:$8 sps:$4 sm:$0xff]  }
 0x10d   :  { %938 = vmatprep.subr.bf16.mxu0 %v1581_v57  ;;  %1405 = vmatprep.subr.bf16.mxu1 %v1623_v27  ;;  %v1628_v57 = vld [vmem:[#allocation4 + $0x310] ss:$8 sps:$4 sm:$0xff]  }
 0x110   :  { %939 = vmatpush1.bf16.msra.mxu0 %v1579_v58  ;;  %1406 = vmatpush3.bf16.msra.mxu1 %v1624_v28  ;;  %v1629_v58 = vld [vmem:[#allocation4 + $0x380] ss:$8 sps:$4 sm:$0xff]  }
 0x111   :  { %940 = vmatprep.subr.bf16.mxu0 %v1584_v59  ;;  %1407 = vmatprep.subr.bf16.mxu1 %v1625_v54  ;;  %v1630_v59 = vld [vmem:[#allocation4 + $0x300] ss:$8 sps:$4 sm:$0xff]  }
 0x114   :  { %941 = vmatpush1.bf16.msra.mxu0 %v1582_v60  ;;  %1408 = vmatpush3.bf16.msra.mxu1 %v1626_v55  ;;  %v1711_v60 = vmov 0.0  }
 0x115   :  { %942 = vmatprep.subr.bf16.mxu0 %v1587_v61  ;;  %1409 = vmatprep.subr.bf16.mxu1 %v1627_v56  ;;  %v758_v61 = vld [vmem:[#allocation6 + $0x2] ss:$8 sm:$0x3] }
 0x118   :  { %943 = vmatpush1.bf16.msra.mxu0 %v1585_v62  ;;  %1410 = vmatpush3.bf16.msra.mxu1 %v1628_v57 }
 0x119   :  { %944 = vmatprep.subr.bf16.mxu0 %v1590_v63  ;;  %1411 = vmatprep.subr.bf16.mxu1 %v1629_v58  ;;  %v767_v63 = vrot.slane %v758_v61, %v1750_v13  ;;  %v1632_v13 = vld [vmem:[#allocation4 + $0x364] ss:$8 sps:$4 sm:$0xff]  }
 0x11c   :  { %945 = vmatpush1.bf16.msra.mxu0 %v1588_v0  ;;  %1412 = vmatpush3.bf16.msra.mxu1 %v1630_v59  ;;  %v763_v0 = vrot.slane %v758_v61, %v1752_v15  ;;  %v1633_v15 = vld [vmem:[#allocation4 + $0x354] ss:$8 sps:$4 sm:$0xff]  }
 0x11d   :  { %946 = vmatprep.subr.bf16.mxu0 %v1593_v1  ;;  %1428 = vmatprep.subr.bf16.mxu1 %v1711_v60 }
 0x120   :  { %947 = vmatpush2.bf16.msra.mxu0 %v1591_v2 }
 0x121   :  { %948 = vmatprep.subr.bf16.mxu0 %v1596_v3 }
 0x124   :  { %949 = vmatpush2.bf16.msra.mxu0 %v1594_v4 }
 0x125   :  { %950 = vmatprep.subr.bf16.mxu0 %v1599_v5 }
 0x128   :  { %951 = vmatpush2.bf16.msra.mxu0 %v1597_v6 }
 0x129   :  { %952 = vmatprep.subr.bf16.mxu0 %v1602_v7 }
 0x12c   :  { %953 = vmatpush2.bf16.msra.mxu0 %v1600_v8 }
 0x12d   :  { %954 = vmatprep.subr.bf16.mxu0 %v1605_v9 }
 0x130   :  { %955 = vmatpush2.bf16.msra.mxu0 %v1603_v10 }
 0x131   :  { %956 = vmatprep.subr.bf16.mxu0 %v1608_v11 }
 0x134   :  { %957 = vmatpush2.bf16.msra.mxu0 %v1606_v12 }
 0x135   :  { %958 = vmatprep.subr.bf16.mxu0 %v1611_v14  ;;  %v1631_v14 = vld [vmem:[#allocation4 + $0x374] ss:$8 sps:$4 sm:$0xff]  }
 0x138   :  { %959 = vmatpush2.bf16.msra.mxu0 %v1609_v16 }
 0x139   :  { %960 = vmatprep.subr.bf16.mxu0 %v1614_v17  ;;  %v1634_v17 = vld [vmem:[#allocation4 + $0x344] ss:$8 sps:$4 sm:$0xff]  }
 0x13c   :  { %961 = vmatpush2.bf16.msra.mxu0 %v1612_v18  ;;  %v1635_v18 = vld [vmem:[#allocation4 + $0x334] ss:$8 sps:$4 sm:$0xff]  }
 0x1bf   :  { %v667_v32 = vpop.f32.mrf.mxu0  ;;  %v710_v33 = vpop.f32.mrf.mxu1 }
 0x1c0   :  { %v668_v37 = vadd.f32 %v667_v32, %v306_v31 }
 0x1c1   :  { %v669_v34 = vpop.f32.mrf.mxu0  ;;  %v712_v35 = vpop.f32.mrf.mxu1 }
 0x1c2   :  { %v670_v36 = vadd.f32 %v669_v34, %v310_v30  ;;  %v711_v45 = vadd.f32 %v710_v33, %v668_v37  ;;  %v1168_v34 = vld [vmem:[#allocation6 + $0x4] ss:$0 sm:$0xff] }
 0x1c3   :  { %v671_v38 = vpop.f32.mrf.mxu0  ;;  %v714_v39 = vpop.f32.mrf.mxu1 }
 0x1c4   :  { %v672_v40 = vadd.f32 %v671_v38, %v306_v31  ;;  %v713_v42 = vadd.f32 %v712_v35, %v670_v36  ;;  %v719_v51 = vmax.f32 %v711_v45, 0.0 }
 0x1c5   :  { %v673_v41 = vpop.f32.mrf.mxu0  ;;  %v716_v46 = vpop.f32.mrf.mxu1 }
 0x1c6   :  { %v715_v43 = vadd.f32 %v714_v39, %v672_v40  ;;  %v674_v44 = vadd.f32 %v673_v41, %v310_v30  ;;  %v720_v49 = vmax.f32 %v713_v42, 0.0 }
 0x1c8   :  { %v717_v47 = vadd.f32 %v716_v46, %v674_v44  ;;  %v721_v48 = vmax.f32 %v715_v43, 0.0 }
 0x1ca   :  { %v722_v50 = vmax.f32 %v717_v47, 0.0  ;;  %v723_v53 = vpack.c.bf16 %v721_v48, %v719_v51 }
 0x1cc   :  { %v724_v52 = vpack.c.bf16 %v722_v50, %v720_v49 }
 0x1ce   :  { %962 = vmatprep.mubr.bf16.mxu0 %v724_v52 }
 0x1cf   :  { %963 = vmatmul.mubr.bf16.vlgmr.msra.gmra.mxu0 %v723_v53 }
 0x28f   :  { %v964_v62 = vpop.f32.mrf.mxu0 }
 0x290   :  { %v965_v5 = vadd.f32 %v964_v62, %v763_v0 }
 0x291   :  { %v966_v1 = vpop.f32.mrf.mxu0 }
 0x292   :  { %v967_v3 = vadd.f32 %v966_v1, %v767_v63  ;;  %v973_v11 = vmax.f32 %v965_v5, 0.0 }
 0x293   :  { %v968_v2 = vpop.f32.mrf.mxu0 }
 0x294   :  { %v969_v4 = vadd.f32 %v968_v2, %v763_v0  ;;  %v974_v9 = vmax.f32 %v967_v3, 0.0 }
 0x295   :  { %v970_v6 = vpop.f32.mrf.mxu0 }
 0x296   :  { %v971_v7 = vadd.f32 %v970_v6, %v767_v63  ;;  %v975_v8 = vmax.f32 %v969_v4, 0.0 }
 0x298   :  { %v976_v10 = vmax.f32 %v971_v7, 0.0  ;;  %v977_v16 = vpack.c.bf16 %v975_v8, %v973_v11 }
 0x29a   :  { %v978_v12 = vpack.c.bf16 %v976_v10, %v974_v9 }
 0x29c   :  { %1140 = vmatprep.mubr.bf16.mxu1 %v978_v12 }
 0x29d   :  { %1141 = vmatmul.mubr.bf16.vlgmr.msra.gmra.mxu1 %v977_v16 }
 0x29e   :  { %1429 = vmatpush3.bf16.msra.mxu1 %v1631_v14  ;;  %1444 = vmatprep.mubr.msk.bf16.mxu1 %vm1712_vm1, %v1711_v60 }
 0x29f   :  { %1430 = vmatprep.subr.bf16.mxu1 %v1711_v60 }
 0x2a2   :  { %1431 = vmatpush3.bf16.msra.mxu1 %v1632_v13 }
 0x2a3   :  { %1432 = vmatprep.subr.bf16.mxu1 %v1711_v60 }
 0x2a6   :  { %1433 = vmatpush3.bf16.msra.mxu1 %v1633_v15 }
 0x2a7   :  { %1434 = vmatprep.subr.bf16.mxu1 %v1711_v60 }
 0x2aa   :  { %1435 = vmatpush3.bf16.msra.mxu1 %v1634_v17 }
 0x2ab   :  { %1436 = vmatprep.subr.bf16.mxu1 %v1711_v60 }
 0x2ae   :  { %1437 = vmatpush3.bf16.msra.mxu1 %v1635_v18 }
 0x2af   :  { %1438 = vmatprep.subr.bf16.mxu1 %v1711_v60 }
 0x2b2   :  { %1439 = vmatpush3.bf16.msra.mxu1 %v1636_v19 }
 0x2b3   :  { %1440 = vmatprep.subr.bf16.mxu1 %v1711_v60 }
 0x2b6   :  { %1441 = vmatpush3.bf16.msra.mxu1 %v1637_v20 }
 0x2b7   :  { %1442 = vmatprep.subr.bf16.mxu1 %v1711_v60 }
 0x2ba   :  { %1443 = vmatpush3.bf16.msra.mxu1 %v1638_v21 }
 0x35d   :  { %v1413_v22 = vpop.f32.mrf.mxu1 }
 0x35f   :  { %v1414_v23 = vpop.f32.mrf.mxu1 }
 0x360   :  { %v1415_v24 = vadd.f32 %v1414_v23, %v1413_v22 }
 0x361   :  { %v1416_v26 = vpop.f32.mrf.mxu1 }
 0x362   :  { %v1143_v28 = vadd.f32 %v1415_v24, %v1011_v25 }
 0x363   :  { %v1417_v27 = vpop.f32.mrf.mxu1 }
 0x364   :  { %v1418_v29 = vadd.f32 %v1417_v27, %v1416_v26  ;;  %v1149_v31 = vmax.f32 %v1143_v28, 0.0 }
 0x366   :  { %v1146_v30 = vadd.f32 %v1418_v29, %v1011_v25 }
 0x368   :  { %v1150_v32 = vmax.f32 %v1146_v30, 0.0 }
 0x36a   :  { %v1151_v33 = vpack.c.bf16 %v1150_v32, %v1149_v31 }
 0x36c   :  { %1445 = vmatmul.mubr.bf16.vlgmr.msra.gmra.mxu1 %v1151_v33 }
 0x42c   :  { %v1251_v35 = vpop.f32.mrf.mxu1 }
 0x42d   :  { %v1252_v36 = vadd.f32 %v1251_v35, %v1168_v34 }
 0x42e   :  { %v1446_v37 = vpop.f32.mrf.mxu1 }
 0x42f   :  { %1258 = vst [vmem:[%s1770_s4] sm:$0xff] %v1252_v36 }
 0x430   :  { %v1254_v38 = vpop.f32.mrf.mxu1 }
 0x431   :  { %v1255_v39 = vadd.f32 %v1254_v38, %v1168_v34 }
 0x432   :  { %v1447_v40 = vpop.f32.mrf.mxu1 }
 0x433   :  { %1259 = vst [vmem:[%s1770_s4 + $0x8] sm:$0xff] %v1255_v39 }
 0x434   :  { %1264 = vsyncpa [#allocation3], 1 }
 0x435   :  { %1265 = vsyncpa [#allocation5], 1 }

</bundles_post_ra>
